<compile_context>
chip_gen: v7x
topology: tpu7x:2x2x1
jax: 0.10.0
libtpu: 0.0.40
codegen_flags: <defaults>
</compile_context>

<pallas_src>
import jax
import jax.numpy as jnp
from jax.experimental import pallas as pl
from jax.experimental.pallas import tpu as pltpu

B = 2                               # real batch
M_PAD = 8                           # padded row count (sublane-aligned)
IMG_C, IMG_H, IMG_W = 3, 16, 16     # RGB input (small stand-in for 768x768)
LAT_C, LAT_H, LAT_W = 4, 8, 8       # SD latent layout (4 channels, /8 spatial)
D_IMG = IMG_C * IMG_H * IMG_W       # 768  (6 * 128)
D_LAT = LAT_C * LAT_H * LAT_W       # 256  (2 * 128)
D_TXT = 128                         # text-embedding width (stand-in for 1024)
GUIDANCE = 100.0                    # train_step default guidance_scale


# ----------------------------------------------------------------------------
# Fused kernel: encode_imgs + add_noise + (surrogate) UNet + CFG + SDS grad + loss
# ----------------------------------------------------------------------------
def fused_sds_kernel(scalars_ref, img_ref, noise_ref, txt_u_ref, txt_c_ref,
                     w_enc_ref, w_u_ref, w_t_ref,
                     grad_ref, loss_ref):
    sqrt_ac    = scalars_ref[0]   # sqrt(alphas_cumprod[t])
    sqrt_1m_ac = scalars_ref[1]   # sqrt(1 - alphas_cumprod[t])
    # w = 1 - alphas_cumprod[t].  NOTE: in stable-dreamfusion `self.alphas`
    # IS alphas_cumprod, so this matches `w = 1 - self.alphas[t]`.
    w          = scalars_ref[2]
    guidance   = scalars_ref[3]   # guidance_scale

    # --- encode_imgs -------------------------------------------------------
    # TODO(synk): the real StableDiffusion VAE encoder (conv downsampling
    # stack) is not translated; a deterministic linear projection is used.
    # The 0.18215 SD latent scale is folded into w_enc on the host.
    latents = jnp.dot(img_ref[...], w_enc_ref[...],
                      preferred_element_type=jnp.float32)          # (M, D_LAT) f32

    noise = noise_ref[...]                                          # f32

    # --- scheduler.add_noise(latents, noise, t) ----------------------------
    latents_noisy = sqrt_ac * latents + sqrt_1m_ac * noise          # f32

    # --- UNet surrogate + classifier-free guidance --------------------------
    # TODO(synk): full UNet replaced by the linear surrogate
    #   noise_pred_x = latents_noisy @ W_u + text_x @ W_t.
    # cat([latents_noisy]*2) -> unet -> chunk is factored out: both halves
    # share the latent term, and the CFG combine
    #   pred_text + g*(pred_text - pred_uncond)
    # collapses to a single text matmul with ((1+g)*cond - g*uncond).
    lat_part = jnp.dot(latents_noisy.astype(jnp.bfloat16), w_u_ref[...],
                       preferred_element_type=jnp.float32)
    txt_eff = ((1.0 + guidance) * txt_c_ref[...]
               - guidance * txt_u_ref[...])                         # f32 VPU op, (M, D_TXT)
    noise_pred = lat_part + jnp.dot(txt_eff.astype(jnp.bfloat16), w_t_ref[...],
                                    preferred_element_type=jnp.float32)

    # --- grad = w * (noise_pred - noise); grad = nan_to_num(grad) ------------
    grad = w * (noise_pred - noise)
    fmax = jnp.float32(3.4028235e38)
    grad = jnp.where(jnp.isnan(grad), jnp.float32(0.0), grad)
    grad = jnp.clip(grad, -fmax, fmax)          # +/-inf -> +/-finfo.max (torch.nan_to_num)
    grad_ref[...] = grad

    # --- loss = SpecifyGradient(latents, grad) -------------------------------
    # Emitted as the differentiable-equivalent sum(grad * latents).
    # TODO(synk): if this is ever differentiated end-to-end, `grad` must be
    # treated as a constant (stop_gradient / custom_vjp) to reproduce
    # d(loss)/d(latents) == grad exactly as PyTorch's SpecifyGradient does.
    loss_ref[0, 0] = jnp.sum(grad * latents)


# ----------------------------------------------------------------------------
# Wrapper
# ----------------------------------------------------------------------------
def train_step(input_imgs, text_embeddings, w_enc_bf16, w_u_bf16, w_t_bf16,
               alphas_cumprod, key, guidance_scale=GUIDANCE):
    key_t, key_n = jax.random.split(key)

    # t = torch.randint(min_step, max_step + 1, [1])
    min_step, max_step = 20, 980
    t = jax.random.randint(key_t, (1,), min_step, max_step + 1)[0]

    # Flatten NCHW row-major; pad rows B -> M_PAD (zeros; padded rows produce
    # grad == 0 and contribute 0 to the loss, and are sliced away below).
    pad = M_PAD - B
    img_flat = input_imgs.reshape(B, D_IMG).astype(jnp.float32)
    img_p = jnp.pad(img_flat, ((0, pad), (0, 0))).astype(jnp.bfloat16)

    # noise = torch.randn_like(latents)
    noise = jax.random.normal(key_n, (B, D_LAT), dtype=jnp.float32)
    noise_p = jnp.pad(noise, ((0, pad), (0, 0)))

    # Split [uncond ; cond] on the host: avoids in-kernel sublane slices that
    # cut inside an (8,128) tile (those lower to masked copies on TPU).
    txt_u = jnp.pad(text_embeddings[:B].astype(jnp.float32), ((0, pad), (0, 0)))
    txt_c = jnp.pad(text_embeddings[B:].astype(jnp.float32), ((0, pad), (0, 0)))

    ac_t = alphas_cumprod[t]
    scalars = jnp.stack([jnp.sqrt(ac_t),
                         jnp.sqrt(1.0 - ac_t),
                         1.0 - ac_t,
                         jnp.float32(guidance_scale)]).astype(jnp.float32)

    # TODO(synk): at real SD scale (D_IMG ~ 1.77M, w_enc ~GBs) this must
    # become a K-tiled grid (f32 accumulator scratch, bf16 weight tiles sized
    # against 64 MiB v7x VMEM) with a 'parallel' output axis for megacore.
    grad_p, loss = pl.pallas_call(
        fused_sds_kernel,
        out_shape=(jax.ShapeDtypeStruct((M_PAD, D_LAT), jnp.float32),
                   jax.ShapeDtypeStruct((1, 1), jnp.float32)),
        in_specs=[pl.BlockSpec(memory_space=pltpu.MemorySpace.SMEM),   # scalars
                  pl.BlockSpec(memory_space=pltpu.MemorySpace.VMEM),   # img (bf16)
                  pl.BlockSpec(memory_space=pltpu.MemorySpace.VMEM),   # noise (f32)
                  pl.BlockSpec(memory_space=pltpu.MemorySpace.VMEM),   # txt uncond (f32)
                  pl.BlockSpec(memory_space=pltpu.MemorySpace.VMEM),   # txt cond   (f32)
                  pl.BlockSpec(memory_space=pltpu.MemorySpace.VMEM),   # W_enc (bf16, pre-scaled)
                  pl.BlockSpec(memory_space=pltpu.MemorySpace.VMEM),   # W_u   (bf16)
                  pl.BlockSpec(memory_space=pltpu.MemorySpace.VMEM)],  # W_t   (bf16)
        out_specs=(pl.BlockSpec(memory_space=pltpu.MemorySpace.VMEM),          # grad
                   pl.BlockSpec(memory_space=pltpu.MemorySpace.SMEM)),         # scalar loss
    )(scalars, img_p, noise_p, txt_u, txt_c, w_enc_bf16, w_u_bf16, w_t_bf16)

    return grad_p[:B], loss


if __name__ == "__main__":
    key = jax.random.PRNGKey(0)
    k_img, k_txt, k_we, k_wu, k_wt, k_step = jax.random.split(key, 6)

    # Deterministic inputs / parameters (synthetic; no checkpoint load).
    input_imgs = jax.random.uniform(k_img, (B, IMG_C, IMG_H, IMG_W),
                                    dtype=jnp.float32)                 # NCHW
    text_embeddings = jax.random.normal(k_txt, (2 * B, D_TXT),
                                        dtype=jnp.float32)             # [uncond; cond]

    # VAE-encoder surrogate weight: fold the 0.18215 SD latent scaling into
    # the weight on the host (removes a full-tile VPU multiply in-kernel),
    # and store all matmul weights in bf16 (halves weight DMA bytes).
    w_enc = (0.18215 * 0.02 *
             jax.random.normal(k_we, (D_IMG, D_LAT), dtype=jnp.float32)
             ).astype(jnp.bfloat16)
    w_u = (0.02 * jax.random.normal(k_wu, (D_LAT, D_LAT), dtype=jnp.float32)
           ).astype(jnp.bfloat16)
    w_t_proj = (0.02 * jax.random.normal(k_wt, (D_TXT, D_LAT), dtype=jnp.float32)
                ).astype(jnp.bfloat16)

    # Stable-Diffusion-style linear beta schedule -> alphas_cumprod (1000 steps)
    T = 1000
    betas = jnp.linspace(0.00085 ** 0.5, 0.012 ** 0.5, T, dtype=jnp.float32) ** 2
    alphas_cumprod = jnp.cumprod(1.0 - betas)

    grad, loss = train_step(input_imgs, text_embeddings, w_enc, w_u, w_t_proj,
                            alphas_cumprod, k_step)
    jax.block_until_ready((grad, loss))
    print("KERNEL_OK")
</pallas_src>

<mosaic_0001>
module attributes {stable_mosaic.version = 11 : i64} {
  func.func @fused_sds_kernel(%arg0: memref<4xf32, #tpu.memory_space<smem>>, %arg1: memref<8x768xbf16, #tpu.memory_space<vmem>>, %arg2: memref<8x256xf32, #tpu.memory_space<vmem>>, %arg3: memref<8x128xf32, #tpu.memory_space<vmem>>, %arg4: memref<8x128xf32, #tpu.memory_space<vmem>>, %arg5: memref<768x256xbf16, #tpu.memory_space<vmem>>, %arg6: memref<256x256xbf16, #tpu.memory_space<vmem>>, %arg7: memref<128x256xbf16, #tpu.memory_space<vmem>>, %arg8: memref<8x256xf32, #tpu.memory_space<vmem>>, %arg9: memref<1x1xf32, #tpu.memory_space<smem>>) attributes {dimension_semantics = [], scalar_prefetch = 0 : i64, scratch_operands = 0 : i64, tpu.core_type = #tpu.core_type<tc>} {
    %c0 = arith.constant 0 : index
    %0 = memref.load %arg0[%c0] : memref<4xf32, #tpu.memory_space<smem>>
    %c1 = arith.constant 1 : index
    %1 = memref.load %arg0[%c1] : memref<4xf32, #tpu.memory_space<smem>>
    %c2 = arith.constant 2 : index
    %2 = memref.load %arg0[%c2] : memref<4xf32, #tpu.memory_space<smem>>
    %c3 = arith.constant 3 : index
    %3 = memref.load %arg0[%c3] : memref<4xf32, #tpu.memory_space<smem>>
    %c0_0 = arith.constant 0 : index
    %c0_1 = arith.constant 0 : index
    %4 = vector.load %arg1[%c0_0, %c0_1] : memref<8x768xbf16, #tpu.memory_space<vmem>>, vector<8x768xbf16>
    %c0_2 = arith.constant 0 : index
    %c0_3 = arith.constant 0 : index
    %5 = vector.load %arg5[%c0_2, %c0_3] : memref<768x256xbf16, #tpu.memory_space<vmem>>, vector<768x256xbf16>
    %cst = arith.constant dense<0.000000e+00> : vector<8x256xf32>
    %6 = tpu.matmul %4, %5, %cst {dimension_numbers = #tpu.dot_dimension_numbers<[1], [0], [0], [1], [0, 0, 1, 1], [], []>} : vector<8x768xbf16>, vector<768x256xbf16>, vector<8x256xf32> -> vector<8x256xf32>
    %c0_4 = arith.constant 0 : index
    %c0_5 = arith.constant 0 : index
    %7 = vector.load %arg2[%c0_4, %c0_5] : memref<8x256xf32, #tpu.memory_space<vmem>>, vector<8x256xf32>
    %8 = vector.broadcast %0 : f32 to vector<8x256xf32>
    %9 = arith.mulf %8, %6 : vector<8x256xf32>
    %10 = vector.broadcast %1 : f32 to vector<8x256xf32>
    %11 = arith.mulf %10, %7 : vector<8x256xf32>
    %12 = arith.addf %9, %11 : vector<8x256xf32>
    %13 = arith.truncf %12 : vector<8x256xf32> to vector<8x256xbf16>
    %c0_6 = arith.constant 0 : index
    %c0_7 = arith.constant 0 : index
    %14 = vector.load %arg6[%c0_6, %c0_7] : memref<256x256xbf16, #tpu.memory_space<vmem>>, vector<256x256xbf16>
    %cst_8 = arith.constant dense<0.000000e+00> : vector<8x256xf32>
    %15 = tpu.matmul %13, %14, %cst_8 {dimension_numbers = #tpu.dot_dimension_numbers<[1], [0], [0], [1], [0, 0, 1, 1], [], []>} : vector<8x256xbf16>, vector<256x256xbf16>, vector<8x256xf32> -> vector<8x256xf32>
    %cst_9 = arith.constant 1.000000e+00 : f32
    %16 = arith.addf %cst_9, %3 : f32
    %c0_10 = arith.constant 0 : index
    %c0_11 = arith.constant 0 : index
    %17 = vector.load %arg4[%c0_10, %c0_11] : memref<8x128xf32, #tpu.memory_space<vmem>>, vector<8x128xf32>
    %18 = vector.broadcast %16 : f32 to vector<8x128xf32>
    %19 = arith.mulf %18, %17 : vector<8x128xf32>
    %c0_12 = arith.constant 0 : index
    %c0_13 = arith.constant 0 : index
    %20 = vector.load %arg3[%c0_12, %c0_13] : memref<8x128xf32, #tpu.memory_space<vmem>>, vector<8x128xf32>
    %21 = vector.broadcast %3 : f32 to vector<8x128xf32>
    %22 = arith.mulf %21, %20 : vector<8x128xf32>
    %23 = arith.subf %19, %22 : vector<8x128xf32>
    %24 = arith.truncf %23 : vector<8x128xf32> to vector<8x128xbf16>
    %c0_14 = arith.constant 0 : index
    %c0_15 = arith.constant 0 : index
    %25 = vector.load %arg7[%c0_14, %c0_15] : memref<128x256xbf16, #tpu.memory_space<vmem>>, vector<128x256xbf16>
    %cst_16 = arith.constant dense<0.000000e+00> : vector<8x256xf32>
    %26 = tpu.matmul %24, %25, %cst_16 {dimension_numbers = #tpu.dot_dimension_numbers<[1], [0], [0], [1], [0, 0, 1, 1], [], []>} : vector<8x128xbf16>, vector<128x256xbf16>, vector<8x256xf32> -> vector<8x256xf32>
    %27 = arith.addf %15, %26 : vector<8x256xf32>
    %28 = arith.subf %27, %7 : vector<8x256xf32>
    %29 = vector.broadcast %2 : f32 to vector<8x256xf32>
    %30 = arith.mulf %29, %28 : vector<8x256xf32>
    %31 = arith.cmpf one, %30, %30 : vector<8x256xf32>
    %cst_17 = arith.constant 0.000000e+00 : f32
    %32 = vector.broadcast %cst_17 : f32 to vector<8x256xf32>
    %33 = arith.select %31, %32, %30 : vector<8x256xi1>, vector<8x256xf32>
    %cst_18 = arith.constant 0.000000e+00 : f32
    %cst_19 = arith.constant 3.40282347E+38 : f32
    %34 = arith.subf %cst_18, %cst_19 : f32
    %cst_20 = arith.constant 3.40282347E+38 : f32
    %35 = vector.broadcast %34 : f32 to vector<8x256xf32>
    %36 = arith.maximumf %35, %33 : vector<8x256xf32>
    %37 = vector.broadcast %cst_20 : f32 to vector<8x256xf32>
    %38 = arith.minimumf %37, %36 : vector<8x256xf32>
    %c0_21 = arith.constant 0 : index
    %c0_22 = arith.constant 0 : index
    %39 = vector.load %arg8[%c0_21, %c0_22] : memref<8x256xf32, #tpu.memory_space<vmem>>, vector<8x256xf32>
    tpu.vector_store %arg8[%c0_21, %c0_22], %38 {strides = array<i32>} : memref<8x256xf32, #tpu.memory_space<vmem>>, vector<8x256xf32>,
    %40 = arith.mulf %38, %6 : vector<8x256xf32>
    %41 = vector.shape_cast %40 : vector<8x256xf32> to vector<1x8x256xf32>
    %cst_23 = arith.constant dense<0.000000e+00> : vector<1xf32>
    %42 = vector.multi_reduction <add>, %41, %cst_23 [1, 2] : vector<1x8x256xf32> to vector<1xf32>
    %43 = vector.shape_cast %42 : vector<1xf32> to vector<1x1x1xf32>
    %44 = vector.extract %43[0, 0, 0] : f32 from vector<1x1x1xf32>
    %c0_24 = arith.constant 0 : index
    %c0_25 = arith.constant 0 : index
    %45 = memref.load %arg9[%c0_24, %c0_25] : memref<1x1xf32, #tpu.memory_space<smem>>
    memref.store %44, %arg9[%c0_24, %c0_25] : memref<1x1xf32, #tpu.memory_space<smem>>
    return
  }
}

</mosaic_0001>

<bundles_post_ra>
// kernel: tpu_custom_call.1
= control target key start
LH: loop header
LB: loop body
LE: loop exit
PB: predicated region body
PF: predicated region fallthrough
CT: control target
= control target key end

     0   :  { %15 = vsyncpa [#allocation5], 0  ;;  %s2094_s0 = inlined_call_operand.hbm [shape: f32[4], index: 0, kind: input, shape index: {}]   ;;  %s2095_s1 = inlined_call_operand.hbm [shape: bf16[8,768], index: 1, kind: input, shape index: {}]   ;;  %s2096_s2 = inlined_call_operand.hbm [shape: f32[8,256], index: 2, kind: input, shape index: {}]   ;;  %s2097_s3 = inlined_call_operand.vmem [shape: f32[8,128], index: 3, kind: input, shape index: {}]   ;;  %s2098_s4 = inlined_call_operand.hbm [shape: f32[8,128], index: 4, kind: input, shape index: {}]   ;;  %s2099_s5 = inlined_call_operand.hbm [shape: bf16[768,256], index: 5, kind: input, shape index: {}]   ;;  %s2100_s6 = inlined_call_operand.hbm [shape: bf16[256,256], index: 6, kind: input, shape index: {}]   ;;  %s2101_s7 = inlined_call_operand.hbm [shape: bf16[128,256], index: 7, kind: input, shape index: {}]   ;;  %s2102_s8 = inlined_call_operand.hbm [shape: f32[8,256], index: 8, kind: output, shape index: {0}]   ;;  %s2103_s9 = inlined_call_operand.hbm [shape: f32[1,1], index: 9, kind: output, shape index: {1}]  }
   0x1   :  { %16 = vsyncpa [#allocation3], 0 }
   0x2   :  { %17 = vsyncpa [#allocation9], 0 }
   0x3   :  { %18 = vsyncpa [#allocation12], 0 }
   0x4   :  { %19 = vsyncpa [#allocation15], 0 }
   0x5   :  { %20 = vsyncpa [#allocation4], 0 }
   0x6   :  { %21 = vsyncpa [#allocation6], 0  ;;  %s1889_s30 = smov [#allocation8]   ;;  %s1890_s11 = smov [#allocation11]  }
   0x7   :  { %s46_s10 = sshll.u32 %s1889_s30, 4  ;;  %s67_s12 = sshll.u32 %s1890_s11, 4  ;;  %s47_s10 = int_to_ptr.vmem [resolvable:$true] %s46_s10  ;;  %s1951_s12 = int_to_ptr.vmem [resolvable:$true] %s67_s12 }
   0x8   :  { %s1701_s15 = scalar_lea.hbm %s2096_s2, 256 }
   0x9   :  { %p1702_p0 = scmp.ne.s32.totalorder %s2096_s2, %s1701_s15  ;;  %p1705_p1 = scmp.lt.u32.totalorder %s1701_s15, %s2096_s2 }
   0xb   :  { %p1707_p2 = pnand %p1705_p1, %p1702_p0 }
   0xd   :  { %1710 = shalt.err (!%p1707_p2)
}
   0xe   :  { %s1711_s20 = scalar_lea.vmem %s47_s10, 256  ;;  %p1716_p4 = scmp.lt.s32.totalorder %s47_s10, %s47_s10 }
   0xf   :  { %p1712_p3 = scmp.ne.s32.totalorder %s47_s10, %s1711_s20  ;;  %p1717_p5 = scmp.lt.s32.totalorder %s1711_s20, %s1711_s20 }
  0x11   :  { %p1718_p6 = por %p1717_p5, %p1716_p4 }
  0x13   :  { %p1719_p7 = pnand %p1718_p6, %p1712_p3 }
  0x15   :  { %1722 = shalt.err (!%p1719_p7)
}
  0x16   :  { %49 = dma.hbm_to_vmem [thread:$0]  %s2096_s2, 256, %s47_s10, [#allocation9]  }
  0x17   :  { %s1723_s25 = scalar_lea.hbm %s2099_s5, 12288 }
  0x18   :  { %p1724_p8 = scmp.ne.s32.totalorder %s2099_s5, %s1723_s25  ;;  %p1727_p9 = scmp.lt.u32.totalorder %s1723_s25, %s2099_s5 }
  0x1a   :  { %p1729_p10 = pnand %p1727_p9, %p1724_p8 }
  0x1c   :  { %1732 = shalt.err (!%p1729_p10)
}
  0x1d   :  { %s1733_s30 = scalar_lea.vmem %s1951_s12, 12288  ;;  %p1738_p12 = scmp.lt.s32.totalorder %s1951_s12, %s1951_s12 }
  0x1e   :  { %p1734_p11 = scmp.ne.s32.totalorder %s1951_s12, %s1733_s30  ;;  %p1739_p13 = scmp.lt.s32.totalorder %s1733_s30, %s1733_s30 }
  0x20   :  { %p1740_p0 = por %p1739_p13, %p1738_p12 }
  0x22   :  { %p1741_p1 = pnand %p1740_p0, %p1734_p11 }
  0x24   :  { %1744 = shalt.err (!%p1741_p1)
}
  0x25   :  { %s1891_s2 = smov 128   ;;  %s1892_s10 = smov 8  }
  0x26   :  { %73 = dma.hbm_to_vmem [thread:$0]  %s2099_s5, 12288, %s1951_s12, [#allocation12], %s1891_s2, %s1891_s2, %s1892_s10  }
  0x27   :  { %s1745_s16 = scalar_lea.hbm %s2094_s0, 16 }
  0x28   :  { %p1746_p2 = scmp.ne.s32.totalorder %s2094_s0, %s1745_s16  ;;  %p1749_p3 = scmp.lt.u32.totalorder %s1745_s16, %s2094_s0 }
  0x2a   :  { %p1751_p4 = pnand %p1749_p3, %p1746_p2 }
  0x2c   :  { %1754 = shalt.err (!%p1751_p4)
}
  0x2d   :  { %s1893_s21 = smov [#allocation2]   ;;  %s1894_s5 = smov [#allocation7]  }
  0x2e   :  { %29 = dma.hbm_to_smem %s2094_s0, 16, %s1893_s21, [#allocation5]  }
  0x2f   :  { %s36_s12 = sshll.u32 %s1894_s5, 4  ;;  %s1895_s24 = smov [#allocation10]   ;;  %s37_s12 = int_to_ptr.vmem [resolvable:$true] %s36_s12 }
  0x30   :  { %s58_s25 = sshll.u32 %s1895_s24, 4  ;;  %s1755_s28 = scalar_lea.hbm %s2095_s1, 384  ;;  %s59_s25 = int_to_ptr.vmem [resolvable:$true] %s58_s25 }
  0x31   :  { %p1756_p5 = scmp.ne.s32.totalorder %s2095_s1, %s1755_s28  ;;  %p1759_p6 = scmp.lt.u32.totalorder %s1755_s28, %s2095_s1 }
  0x33   :  { %p1761_p7 = pnand %p1759_p6, %p1756_p5 }
  0x35   :  { %1764 = shalt.err (!%p1761_p7)
}
  0x36   :  { %s1765_s0 = scalar_lea.vmem %s37_s12, 384  ;;  %p1770_p9 = scmp.lt.s32.totalorder %s37_s12, %s37_s12 }
  0x37   :  { %p1766_p8 = scmp.ne.s32.totalorder %s37_s12, %s1765_s0  ;;  %p1771_p10 = scmp.lt.s32.totalorder %s1765_s0, %s1765_s0 }
  0x39   :  { %p1772_p11 = por %p1771_p10, %p1770_p9 }
  0x3b   :  { %p1773_p12 = pnand %p1772_p11, %p1766_p8 }
  0x3d   :  { %1776 = shalt.err (!%p1773_p12)
}
  0x3e   :  { %39 = dma.hbm_to_vmem [thread:$0]  %s2095_s1, 384, %s37_s12, [#allocation3]  }
  0x3f   :  { %s1777_s18 = scalar_lea.hbm %s2098_s4, 128 }
  0x40   :  { %p1778_p13 = scmp.ne.s32.totalorder %s2098_s4, %s1777_s18  ;;  %p1781_p0 = scmp.lt.u32.totalorder %s1777_s18, %s2098_s4 }
  0x42   :  { %p1783_p1 = pnand %p1781_p0, %p1778_p13 }
  0x44   :  { %1786 = shalt.err (!%p1783_p1)
}
  0x45   :  { %s1787_s23 = scalar_lea.vmem %s59_s25, 128  ;;  %p1792_p3 = scmp.lt.s32.totalorder %s59_s25, %s59_s25 }
  0x46   :  { %p1788_p2 = scmp.ne.s32.totalorder %s59_s25, %s1787_s23  ;;  %p1793_p4 = scmp.lt.s32.totalorder %s1787_s23, %s1787_s23 }
  0x48   :  { %p1794_p5 = por %p1793_p4, %p1792_p3 }
  0x4a   :  { %p1795_p6 = pnand %p1794_p5, %p1788_p2 }
  0x4c   :  { %1798 = shalt.err (!%p1795_p6)
}
  0x4d   :  { %61 = dma.hbm_to_vmem [thread:$0]  %s2098_s4, 128, %s59_s25, [#allocation9]  }
  0x4e   :  { %s1896_s12 = smov [#allocation13]   ;;  %s1897_s26 = smov [#allocation14]  }
  0x4f   :  { %s79_s24 = sshll.u32 %s1896_s12, 4  ;;  %s91_s27 = sshll.u32 %s1897_s26, 4  ;;  %s80_s24 = int_to_ptr.vmem [resolvable:$true] %s79_s24  ;;  %s92_s27 = int_to_ptr.vmem [resolvable:$true] %s91_s27 }
  0x50   :  { %s1799_s30 = scalar_lea.hbm %s2100_s6, 4096 }
  0x51   :  { %p1800_p7 = scmp.ne.s32.totalorder %s2100_s6, %s1799_s30  ;;  %p1803_p8 = scmp.lt.u32.totalorder %s1799_s30, %s2100_s6 }
  0x53   :  { %p1805_p9 = pnand %p1803_p8, %p1800_p7 }
  0x55   :  { %1808 = shalt.err (!%p1805_p9)
}
  0x56   :  { %s1809_s4 = scalar_lea.vmem %s80_s24, 4096  ;;  %p1814_p11 = scmp.lt.s32.totalorder %s80_s24, %s80_s24 }
  0x57   :  { %p1810_p10 = scmp.ne.s32.totalorder %s80_s24, %s1809_s4  ;;  %p1815_p12 = scmp.lt.s32.totalorder %s1809_s4, %s1809_s4 }
  0x59   :  { %p1816_p13 = por %p1815_p12, %p1814_p11 }
  0x5b   :  { %p1817_p0 = pnand %p1816_p13, %p1810_p10 }
  0x5d   :  { %1820 = shalt.err (!%p1817_p0)
}
  0x5e   :  { %85 = dma.hbm_to_vmem [thread:$0]  %s2100_s6, 4096, %s80_s24, [#allocation12], %s1891_s2, %s1891_s2, %s1892_s10  }
  0x5f   :  { %s1821_s18 = scalar_lea.hbm %s2101_s7, 2048 }
  0x60   :  { %p1822_p1 = scmp.ne.s32.totalorder %s2101_s7, %s1821_s18  ;;  %p1825_p2 = scmp.lt.u32.totalorder %s1821_s18, %s2101_s7 }
  0x62   :  { %p1827_p3 = pnand %p1825_p2, %p1822_p1 }
  0x64   :  { %1830 = shalt.err (!%p1827_p3)
}
  0x65   :  { %s1831_s23 = scalar_lea.vmem %s92_s27, 2048  ;;  %p1836_p5 = scmp.lt.s32.totalorder %s92_s27, %s92_s27 }
  0x66   :  { %p1832_p4 = scmp.ne.s32.totalorder %s92_s27, %s1831_s23  ;;  %p1837_p6 = scmp.lt.s32.totalorder %s1831_s23, %s1831_s23 }
  0x68   :  { %p1838_p7 = por %p1837_p6, %p1836_p5 }
  0x6a   :  { %p1839_p8 = pnand %p1838_p7, %p1832_p4 }
  0x6c   :  { %1842 = shalt.err (!%p1839_p8)
}
  0x6d   :  { %97 = dma.hbm_to_vmem [thread:$0]  %s2101_s7, 2048, %s92_s27, [#allocation15], %s1891_s2, %s1891_s2, %s1892_s10  }
  0x6e   :  { %1875 = dma.done.wait [#allocation5], 16  }
  0x6f   :  { %1876 = vsyncadd [#allocation5], 4294967280 }
  0x70   :  { %1877 = dma.done.wait [#allocation3], 384  }
  0x71   :  { %1878 = vsyncadd [#allocation3], 4294966912 }
  0x72   :  { %1879 = dma.done.wait [#allocation9], 384  }
  0x73   :  { %1880 = vsyncadd [#allocation9], 4294966912 }
  0x74   :  { %1881 = dma.done.wait [#allocation12], 16384  }
  0x75   :  { %1882 = vsyncadd [#allocation12], 4294950912 }
  0x76   :  { %1883 = dma.done.wait [#allocation15], 2048  }
  0x77   :  { %1884 = vsyncadd [#allocation15], 4294965248 }
  0x78   :  { %119 = sfence }
  0x79   :  { %v1479_v0 = vld [vmem:[#allocation11 + $0x104] ss:$8 sps:$4 sm:$0xff]   ;;  %v1481_v1 = vld [vmem:[#allocation11 + $0x100] ss:$8 sps:$4 sm:$0xff]   ;;  %v1482_v2 = vld [vmem:[#allocation11 + $0x114] ss:$8 sps:$4 sm:$0xff]  }
  0x7a   :  { %766 = vmatprep.subr.bf16.mxu0 %v1479_v0  ;;  %v1484_v3 = vld [vmem:[#allocation11 + $0x110] ss:$8 sps:$4 sm:$0xff]   ;;  %v1485_v4 = vld [vmem:[#allocation11 + $0x124] ss:$8 sps:$4 sm:$0xff]   ;;  %v1487_v5 = vld [vmem:[#allocation11 + $0x120] ss:$8 sps:$4 sm:$0xff]  }
  0x7b   :  { %767 = vmatpush1.bf16.msra.mxu0 %v1481_v1  ;;  %v1488_v6 = vld [vmem:[#allocation11 + $0x134] ss:$8 sps:$4 sm:$0xff]   ;;  %v1490_v7 = vld [vmem:[#allocation11 + $0x130] ss:$8 sps:$4 sm:$0xff]   ;;  %v1491_v8 = vld [vmem:[#allocation11 + $0x144] ss:$8 sps:$4 sm:$0xff]  }
  0x7c   :  { %768 = vmatprep.subr.bf16.mxu0 %v1482_v2  ;;  %v1493_v9 = vld [vmem:[#allocation11 + $0x140] ss:$8 sps:$4 sm:$0xff]   ;;  %v1494_v10 = vld [vmem:[#allocation11 + $0x154] ss:$8 sps:$4 sm:$0xff]   ;;  %v1496_v11 = vld [vmem:[#allocation11 + $0x150] ss:$8 sps:$4 sm:$0xff]  }
  0x7d   :  { %v1497_v12 = vld [vmem:[#allocation11 + $0x164] ss:$8 sps:$4 sm:$0xff]   ;;  %v1529_v14 = vld [vmem:[#allocation11] ss:$8 sps:$4 sm:$0xff]   ;;  %v2051_v15 = vld [vmem:[#allocation7 + $0x8] sm:$0xff]  ;;  %s2061_s7 = sld [smem:[#allocation2 + $0x3]] }
  0x7e   :  { %v1526_v13 = vld [vmem:[#allocation11 + $0x4] ss:$8 sps:$4 sm:$0xff]   ;;  %v1499_v16 = vld [vmem:[#allocation11 + $0x160] ss:$8 sps:$4 sm:$0xff]   ;;  %v1306_v17 = vcombine.high %v2051_v15, %v2051_v15  ;;  %v1500_v18 = vld [vmem:[#allocation11 + $0x174] ss:$8 sps:$4 sm:$0xff]   ;;  %v1305_v58 = vcombine.low %v2051_v15, %v2051_v15 }
  0x7f   :  { %769 = vmatpush1.bf16.msra.mxu0 %v1484_v3  ;;  %725 = vmatprep.subr.bf16.mxu1 %v1526_v13  ;;  %v1535_v19 = vld [vmem:[#allocation11 + $0x14] ss:$8 sps:$4 sm:$0xff]   ;;  %v1537_v20 = vld [vmem:[#allocation11 + $0x10] ss:$8 sps:$4 sm:$0xff]   ;;  %v1503_v22 = vld [vmem:[#allocation11 + $0x184] ss:$8 sps:$4 sm:$0xff]  }
  0x80   :  { %770 = vmatprep.subr.bf16.mxu0 %v1485_v4  ;;  %726 = vmatpush1.bf16.msra.mxu1 %v1529_v14  ;;  %v1502_v21 = vld [vmem:[#allocation11 + $0x170] ss:$8 sps:$4 sm:$0xff]   ;;  %v1541_v23 = vld [vmem:[#allocation11 + $0x24] ss:$8 sps:$4 sm:$0xff]   ;;  %v1543_v24 = vld [vmem:[#allocation11 + $0x20] ss:$8 sps:$4 sm:$0xff]  }
  0x81   :  { %798 = vmatprep.mubr.bf16.mxu0 %v1306_v17  ;;  %727 = vmatprep.subr.bf16.mxu1 %v1535_v19  ;;  %v1505_v25 = vld [vmem:[#allocation11 + $0x180] ss:$8 sps:$4 sm:$0xff]   ;;  %v1547_v26 = vld [vmem:[#allocation11 + $0x34] ss:$8 sps:$4 sm:$0xff]   ;;  %v1549_v28 = vld [vmem:[#allocation11 + $0x30] ss:$8 sps:$4 sm:$0xff]  }
  0x82   :  { %v1506_v27 = vld [vmem:[#allocation11 + $0x194] ss:$8 sps:$4 sm:$0xff]   ;;  %v1553_v29 = vld [vmem:[#allocation11 + $0x44] ss:$8 sps:$4 sm:$0xff]   ;;  %v1508_v30 = vld [vmem:[#allocation11 + $0x190] ss:$8 sps:$4 sm:$0xff]  }
  0x83   :  { %771 = vmatpush1.bf16.msra.mxu0 %v1487_v5  ;;  %v1509_v31 = vld [vmem:[#allocation11 + $0x1a4] ss:$8 sps:$4 sm:$0xff]   ;;  %v1555_v32 = vld [vmem:[#allocation11 + $0x40] ss:$8 sps:$4 sm:$0xff]   ;;  %v1559_v33 = vld [vmem:[#allocation11 + $0x54] ss:$8 sps:$4 sm:$0xff]  }
  0x84   :  { %772 = vmatprep.subr.bf16.mxu0 %v1488_v6  ;;  %728 = vmatpush1.bf16.msra.mxu1 %v1537_v20  ;;  %v1511_v34 = vld [vmem:[#allocation11 + $0x1a0] ss:$8 sps:$4 sm:$0xff]   ;;  %v1512_v35 = vld [vmem:[#allocation11 + $0x1b4] ss:$8 sps:$4 sm:$0xff]   ;;  %v1561_v36 = vld [vmem:[#allocation11 + $0x50] ss:$8 sps:$4 sm:$0xff]  }
  0x85   :  { %729 = vmatprep.subr.bf16.mxu1 %v1541_v23  ;;  %v1565_v37 = vld [vmem:[#allocation11 + $0x64] ss:$8 sps:$4 sm:$0xff]   ;;  %v1514_v38 = vld [vmem:[#allocation11 + $0x1b0] ss:$8 sps:$4 sm:$0xff]   ;;  %v1567_v40 = vld [vmem:[#allocation11 + $0x60] ss:$8 sps:$4 sm:$0xff]  }
  0x86   :  { %v1515_v39 = vld [vmem:[#allocation11 + $0x1c4] ss:$8 sps:$4 sm:$0xff]   ;;  %v1571_v41 = vld [vmem:[#allocation11 + $0x74] ss:$8 sps:$4 sm:$0xff]   ;;  %v1517_v42 = vld [vmem:[#allocation11 + $0x1c0] ss:$8 sps:$4 sm:$0xff]  }
  0x87   :  { %773 = vmatpush1.bf16.msra.mxu0 %v1490_v7  ;;  %v1518_v43 = vld [vmem:[#allocation11 + $0x1d4] ss:$8 sps:$4 sm:$0xff]   ;;  %v1573_v44 = vld [vmem:[#allocation11 + $0x70] ss:$8 sps:$4 sm:$0xff]   ;;  %v1577_v45 = vld [vmem:[#allocation11 + $0x84] ss:$8 sps:$4 sm:$0xff]  }
  0x88   :  { %774 = vmatprep.subr.bf16.mxu0 %v1491_v8  ;;  %730 = vmatpush1.bf16.msra.mxu1 %v1543_v24  ;;  %v1520_v46 = vld [vmem:[#allocation11 + $0x1d0] ss:$8 sps:$4 sm:$0xff]   ;;  %v1521_v47 = vld [vmem:[#allocation11 + $0x1e4] ss:$8 sps:$4 sm:$0xff]   ;;  %v1579_v48 = vld [vmem:[#allocation11 + $0x80] ss:$8 sps:$4 sm:$0xff]  }
  0x89   :  { %731 = vmatprep.subr.bf16.mxu1 %v1547_v26  ;;  %v1583_v49 = vld [vmem:[#allocation11 + $0x94] ss:$8 sps:$4 sm:$0xff]   ;;  %v1523_v50 = vld [vmem:[#allocation11 + $0x1e0] ss:$8 sps:$4 sm:$0xff]   ;;  %v1585_v52 = vld [vmem:[#allocation11 + $0x90] ss:$8 sps:$4 sm:$0xff]  }
  0x8a   :  { %v1524_v51 = vld [vmem:[#allocation11 + $0x1f4] ss:$8 sps:$4 sm:$0xff]   ;;  %v1589_v53 = vld [vmem:[#allocation11 + $0xa4] ss:$8 sps:$4 sm:$0xff]   ;;  %v1528_v54 = vld [vmem:[#allocation11 + $0x1f0] ss:$8 sps:$4 sm:$0xff]  }
  0x8b   :  { %775 = vmatpush1.bf16.msra.mxu0 %v1493_v9  ;;  %v1534_v55 = vld [vmem:[#allocation11 + $0x204] ss:$8 sps:$4 sm:$0xff]   ;;  %v1591_v56 = vld [vmem:[#allocation11 + $0xa0] ss:$8 sps:$4 sm:$0xff]   ;;  %v1595_v57 = vld [vmem:[#allocation11 + $0xb4] ss:$8 sps:$4 sm:$0xff]  }
  0x8c   :  { %776 = vmatprep.subr.bf16.mxu0 %v1494_v10  ;;  %732 = vmatpush1.bf16.msra.mxu1 %v1549_v28  ;;  %v1532_v59 = vld [vmem:[#allocation11 + $0x200] ss:$8 sps:$4 sm:$0xff]   ;;  %v125_v60 = vld [vmem:[#allocation7] sm:$0xff]  ;;  %v1601_v1 = vld [vmem:[#allocation11 + $0xc4] ss:$8 sps:$4 sm:$0xff]   ;;  %v1898_v28 = vmov 0  }
  0x8d   :  { %733 = vmatprep.subr.bf16.mxu1 %v1553_v29  ;;  %v1540_v61 = vld [vmem:[#allocation11 + $0x214] ss:$8 sps:$4 sm:$0xff]   ;;  %v1597_v62 = vld [vmem:[#allocation11 + $0xb0] ss:$8 sps:$4 sm:$0xff]   ;;  %v1304_v63 = vcombine.high %v125_v60, %v125_v60  ;;  %v2057_v0 = vld [vmem:[#allocation7 + $0x10] sm:$0xff]  ;;  %s892_s2 = sadd.f32 1.0, %s2061_s7 }
  0x8e   :  { %v1308_v2 = vcombine.high %v2057_v0, %v2057_v0  ;;  %v1538_v3 = vld [vmem:[#allocation11 + $0x210] ss:$8 sps:$4 sm:$0xff]   ;;  %v1546_v4 = vld [vmem:[#allocation11 + $0x224] ss:$8 sps:$4 sm:$0xff]   ;;  %v1603_v5 = vld [vmem:[#allocation11 + $0xc0] ss:$8 sps:$4 sm:$0xff]  }
  0x8f   :  { %777 = vmatpush1.bf16.msra.mxu0 %v1496_v11  ;;  %757 = vmatprep.mubr.bf16.mxu1 %v1304_v63  ;;  %v1607_v6 = vld [vmem:[#allocation11 + $0xd4] ss:$8 sps:$4 sm:$0xff]   ;;  %v1544_v7 = vld [vmem:[#allocation11 + $0x220] ss:$8 sps:$4 sm:$0xff]   ;;  %v1609_v9 = vld [vmem:[#allocation11 + $0xd0] ss:$8 sps:$4 sm:$0xff]  }
  0x90   :  { %778 = vmatprep.subr.bf16.mxu0 %v1497_v12  ;;  %734 = vmatpush1.bf16.msra.mxu1 %v1555_v32  ;;  %v1552_v8 = vld [vmem:[#allocation11 + $0x234] ss:$8 sps:$4 sm:$0xff]   ;;  %v1613_v10 = vld [vmem:[#allocation11 + $0xe4] ss:$8 sps:$4 sm:$0xff]   ;;  %v1550_v11 = vld [vmem:[#allocation11 + $0x230] ss:$8 sps:$4 sm:$0xff]  }
  0x91   :  { %735 = vmatprep.subr.bf16.mxu1 %v1559_v33  ;;  %v1558_v12 = vld [vmem:[#allocation11 + $0x244] ss:$8 sps:$4 sm:$0xff]   ;;  %v1615_v13 = vld [vmem:[#allocation11 + $0xe0] ss:$8 sps:$4 sm:$0xff]   ;;  %v1619_v14 = vld [vmem:[#allocation11 + $0xf4] ss:$8 sps:$4 sm:$0xff]  }
  0x92   :  { %v1556_v15 = vld [vmem:[#allocation11 + $0x240] ss:$8 sps:$4 sm:$0xff]   ;;  %v1621_v17 = vld [vmem:[#allocation11 + $0xf0] ss:$8 sps:$4 sm:$0xff]   ;;  %v1570_v20 = vld [vmem:[#allocation11 + $0x264] ss:$8 sps:$4 sm:$0xff]  }
  0x93   :  { %779 = vmatpush1.bf16.msra.mxu0 %v1499_v16  ;;  %v1564_v16 = vld [vmem:[#allocation11 + $0x254] ss:$8 sps:$4 sm:$0xff]   ;;  %v1562_v19 = vld [vmem:[#allocation11 + $0x250] ss:$8 sps:$4 sm:$0xff]   ;;  %v1568_v24 = vld [vmem:[#allocation11 + $0x260] ss:$8 sps:$4 sm:$0xff]  }
  0x94   :  { %780 = vmatprep.subr.bf16.mxu0 %v1500_v18  ;;  %736 = vmatpush1.bf16.msra.mxu1 %v1561_v36  ;;  %v1631_v18 = vld [vmem:[#allocation14 + $0x4] ss:$8 sps:$4 sm:$0xff]   ;;  %v1634_v23 = vld [vmem:[#allocation14 + $0x14] ss:$8 sps:$4 sm:$0xff]   ;;  %v1632_v26 = vld [vmem:[#allocation14 + $0x10] ss:$8 sps:$4 sm:$0xff]  }
  0x95   :  { %737 = vmatprep.subr.bf16.mxu1 %v1565_v37  ;;  %v1574_v29 = vld [vmem:[#allocation11 + $0x270] ss:$8 sps:$4 sm:$0xff]   ;;  %v1640_v32 = vld [vmem:[#allocation14 + $0x34] ss:$8 sps:$4 sm:$0xff]   ;;  %v1580_v33 = vld [vmem:[#allocation11 + $0x280] ss:$8 sps:$4 sm:$0xff]  }
  0x96   :  { %v1643_v36 = vld [vmem:[#allocation14 + $0x44] ss:$8 sps:$4 sm:$0xff]   ;;  %v1586_v37 = vld [vmem:[#allocation11 + $0x290] ss:$8 sps:$4 sm:$0xff]   ;;  %v1653_v63 = vld [vmem:[#allocation13] ss:$8 sps:$4 sm:$0xff]  }
  0x97   :  { %781 = vmatpush1.bf16.msra.mxu0 %v1502_v21  ;;  %v1303_v21 = vcombine.low %v125_v60, %v125_v60  ;;  %v1610_v60 = vld [vmem:[#allocation11 + $0x2d0] ss:$8 sps:$4 sm:$0xff]   ;;  %s121_s12 = sld [smem:[#allocation2]]  ;;  %s1301_s24 = sld [smem:[#allocation2 + $0x2]] }
  0x98   :  { %782 = vmatprep.subr.bf16.mxu0 %v1503_v22  ;;  %738 = vmatpush1.bf16.msra.mxu1 %v1567_v40  ;;  %v1629_v22 = vld [vmem:[#allocation14] ss:$8 sps:$4 sm:$0xff]   ;;  %v1646_v40 = vld [vmem:[#allocation14 + $0x54] ss:$8 sps:$4 sm:$0xff]   ;;  %s1899_s26 = smov [#allocation16]  }
  0x99   :  { %739 = vmatprep.subr.bf16.mxu1 %v1571_v41  ;;  %v1592_v41 = vld [vmem:[#allocation11 + $0x2a0] ss:$8 sps:$4 sm:$0xff]   ;;  %s1274_s27 = sshll.u32 %s1899_s26, 4  ;;  %s1275_s27 = int_to_ptr.vmem [resolvable:$true] %s1274_s27 }
  0x9a   :  { %s1843_s28 = scalar_lea.vmem %s1275_s27, 256  ;;  %p1848_p10 = scmp.lt.s32.totalorder %s1275_s27, %s1275_s27 }
  0x9b   :  { %783 = vmatpush1.bf16.msra.mxu0 %v1505_v25  ;;  %v1576_v25 = vld [vmem:[#allocation11 + $0x274] ss:$8 sps:$4 sm:$0xff]   ;;  %p1844_p9 = scmp.ne.s32.totalorder %s1275_s27, %s1843_s28  ;;  %p1849_p11 = scmp.lt.s32.totalorder %s1843_s28, %s1843_s28 }
  0x9c   :  { %784 = vmatprep.subr.bf16.mxu0 %v1506_v27  ;;  %740 = vmatpush1.bf16.msra.mxu1 %v1573_v44  ;;  %v1637_v27 = vld [vmem:[#allocation14 + $0x24] ss:$8 sps:$4 sm:$0xff]   ;;  %v893_v44 = vld [vmem:[#allocation10] sm:$0xff] }
  0x9d   :  { %741 = vmatprep.subr.bf16.mxu1 %v1577_v45  ;;  %v894_v45 = vstv %s892_s2  ;;  %p1850_p12 = por %p1849_p11, %p1848_p10 }
  0x9f   :  { %785 = vmatpush1.bf16.msra.mxu0 %v1508_v30  ;;  %v1582_v30 = vld [vmem:[#allocation11 + $0x284] ss:$8 sps:$4 sm:$0xff]   ;;  %p1851_p13 = pnand %p1850_p12, %p1844_p9 }
  0xa0   :  { %786 = vmatprep.subr.bf16.mxu0 %v1509_v31  ;;  %742 = vmatpush1.bf16.msra.mxu1 %v1579_v48  ;;  %v1635_v31 = vld [vmem:[#allocation14 + $0x20] ss:$8 sps:$4 sm:$0xff]   ;;  %v1649_v48 = vld [vmem:[#allocation14 + $0x64] ss:$8 sps:$4 sm:$0xff]  }
  0xa1   :  { %743 = vmatprep.subr.bf16.mxu1 %v1583_v49  ;;  %v1598_v49 = vld [vmem:[#allocation11 + $0x2b0] ss:$8 sps:$4 sm:$0xff]  }
  0xa3   :  { %787 = vmatpush1.bf16.msra.mxu0 %v1511_v34  ;;  %v1588_v34 = vld [vmem:[#allocation11 + $0x294] ss:$8 sps:$4 sm:$0xff]  }
  0xa4   :  { %788 = vmatprep.subr.bf16.mxu0 %v1512_v35  ;;  %744 = vmatpush1.bf16.msra.mxu1 %v1585_v52  ;;  %v1638_v35 = vld [vmem:[#allocation14 + $0x30] ss:$8 sps:$4 sm:$0xff]   ;;  %v1606_v52 = vld [vmem:[#allocation11 + $0x2c4] ss:$8 sps:$4 sm:$0xff]  }
  0xa5   :  { %745 = vmatprep.subr.bf16.mxu1 %v1589_v53  ;;  %v1647_v53 = vld [vmem:[#allocation14 + $0x60] ss:$8 sps:$4 sm:$0xff]  }
  0xa7   :  { %789 = vmatpush1.bf16.msra.mxu0 %v1514_v38  ;;  %v1594_v38 = vld [vmem:[#allocation11 + $0x2a4] ss:$8 sps:$4 sm:$0xff]  }
  0xa8   :  { %790 = vmatprep.subr.bf16.mxu0 %v1515_v39  ;;  %746 = vmatpush1.bf16.msra.mxu1 %v1591_v56  ;;  %v1641_v39 = vld [vmem:[#allocation14 + $0x40] ss:$8 sps:$4 sm:$0xff]  }
  0xa9   :  { %747 = vmatprep.subr.bf16.mxu1 %v1595_v57  ;;  %v1612_v57 = vld [vmem:[#allocation11 + $0x2d4] ss:$8 sps:$4 sm:$0xff]  }
  0xab   :  { %791 = vmatpush1.bf16.msra.mxu0 %v1517_v42  ;;  %v1600_v42 = vld [vmem:[#allocation11 + $0x2b4] ss:$8 sps:$4 sm:$0xff]  }
  0xac   :  { %792 = vmatprep.subr.bf16.mxu0 %v1518_v43  ;;  %748 = vmatpush1.bf16.msra.mxu1 %v1597_v62  ;;  %v1644_v43 = vld [vmem:[#allocation14 + $0x50] ss:$8 sps:$4 sm:$0xff]   ;;  %v1618_v62 = vld [vmem:[#allocation11 + $0x2e4] ss:$8 sps:$4 sm:$0xff]  }
  0xad   :  { %749 = vmatprep.subr.bf16.mxu1 %v1601_v1  ;;  %v1658_v1 = vld [vmem:[#allocation13 + $0x14] ss:$8 sps:$4 sm:$0xff]  }
  0xaf   :  { %793 = vmatpush1.bf16.msra.mxu0 %v1520_v46  ;;  %v896_v46 = vld [vmem:[%s2097_s3] sm:$0xff]  ;;  %s1300_s3 = sld [smem:[#allocation2 + $0x1]] }
  0xb0   :  { %794 = vmatprep.subr.bf16.mxu0 %v1521_v47  ;;  %750 = vmatpush1.bf16.msra.mxu1 %v1603_v5  ;;  %v897_v47 = vstv %s2061_s7  ;;  %v1661_v5 = vld [vmem:[#allocation13 + $0x24] ss:$8 sps:$4 sm:$0xff]  }
  0xb1   :  { %751 = vmatprep.subr.bf16.mxu1 %v1607_v6  ;;  %v1624_v6 = vld [vmem:[#allocation11 + $0x2f0] ss:$8 sps:$4 sm:$0xff]  }
  0xb3   :  { %795 = vmatpush1.bf16.msra.mxu0 %v1523_v50  ;;  %v895_v50 = vmul.f32 %v894_v45, %v893_v44 }
  0xb4   :  { %796 = vmatprep.subr.bf16.mxu0 %v1524_v51  ;;  %752 = vmatpush1.bf16.msra.mxu1 %v1609_v9  ;;  %v898_v51 = vmul.f32 %v897_v47, %v896_v46  ;;  %v1307_v9 = vcombine.low %v2057_v0, %v2057_v0  ;;  %v1674_v0 = vld [vmem:[#allocation13 + $0x70] ss:$8 sps:$4 sm:$0xff]  }
  0xb5   :  { %753 = vmatprep.subr.bf16.mxu1 %v1613_v10  ;;  %v1662_v10 = vld [vmem:[#allocation13 + $0x30] ss:$8 sps:$4 sm:$0xff]  }
  0xb6   :  { %v899_v56 = vsub.f32 %v895_v50, %v898_v51 }
  0xb7   :  { %797 = vmatpush1.bf16.msra.mxu0 %v1528_v54  ;;  %v1652_v54 = vld [vmem:[#allocation14 + $0x74] ss:$8 sps:$4 sm:$0xff]  }
  0xb8   :  { %807 = vmatprep.subr.bf16.mxu0 %v1534_v55  ;;  %754 = vmatpush1.bf16.msra.mxu1 %v1615_v13  ;;  %v1604_v55 = vld [vmem:[#allocation11 + $0x2c0] ss:$8 sps:$4 sm:$0xff]   ;;  %v1670_v13 = vld [vmem:[#allocation13 + $0x54] ss:$8 sps:$4 sm:$0xff]  }
  0xb9   :  { %755 = vmatprep.subr.bf16.mxu1 %v1619_v14  ;;  %v1668_v14 = vld [vmem:[#allocation13 + $0x50] ss:$8 sps:$4 sm:$0xff]  }
  0xba   :  { %799 = vmatmul.mubr.bf16.vlgmr.msra.gmra.mrb[0].mxu0 %v1305_v58  ;;  %v1650_v58 = vld [vmem:[#allocation14 + $0x70] ss:$8 sps:$4 sm:$0xff]  }
  0xbb   :  { %808 = vmatpush1.bf16.msra.mxu0 %v1532_v59  ;;  %839 = vmatprep.mubr.bf16.mxu0 %v1308_v2  ;;  %v1655_v59 = vld [vmem:[#allocation13 + $0x4] ss:$8 sps:$4 sm:$0xff]   ;;  %v1616_v2 = vld [vmem:[#allocation11 + $0x2e0] ss:$8 sps:$4 sm:$0xff]  }
  0xbc   :  { %809 = vmatprep.subr.bf16.mxu0 %v1540_v61  ;;  %756 = vmatpush1.bf16.msra.mxu1 %v1621_v17  ;;  %v900_v61 = vpack.c.bf16 %v899_v56, %v899_v56  ;;  %v1676_v17 = vld [vmem:[#allocation13 + $0x74] ss:$8 sps:$4 sm:$0xff]  }
  0xbd   :  { %997 = vmatprep.subr.bf16.mxu1 %v1631_v18  ;;  %v1679_v18 = vld [vmem:[#allocation13 + $0x84] ss:$8 sps:$4 sm:$0xff]  }
  0xbf   :  { %810 = vmatpush1.bf16.msra.mxu0 %v1538_v3  ;;  %758 = vmatmul.mubr.bf16.vlgmr.msra.gmra.mrb[0].mxu1 %v1303_v21  ;;  %v1626_v3 = vld [vmem:[#allocation11 + $0x2f4] ss:$8 sps:$4 sm:$0xff]   ;;  %v1680_v21 = vld [vmem:[#allocation13 + $0x90] ss:$8 sps:$4 sm:$0xff]  }
  0xc0   :  { %811 = vmatprep.subr.bf16.mxu0 %v1546_v4  ;;  %998 = vmatpush1.bf16.msra.mxu1 %v1629_v22  ;;  %v1656_v4 = vld [vmem:[#allocation13 + $0x10] ss:$8 sps:$4 sm:$0xff]   ;;  %v1685_v22 = vld [vmem:[#allocation13 + $0xa4] ss:$8 sps:$4 sm:$0xff]  }
  0xc1   :  { %999 = vmatprep.subr.bf16.mxu1 %v1634_v23  ;;  %1029 = vmatprep.mubr.bf16.mxu1 %v1898_v28  ;;  %v1683_v23 = vld [vmem:[#allocation13 + $0xa0] ss:$8 sps:$4 sm:$0xff]   ;;  %v1692_v28 = vld [vmem:[#allocation13 + $0xd0] ss:$8 sps:$4 sm:$0xff]  }
  0xc3   :  { %812 = vmatpush1.bf16.msra.mxu0 %v1544_v7  ;;  %v1659_v7 = vld [vmem:[#allocation13 + $0x20] ss:$8 sps:$4 sm:$0xff]  }
  0xc4   :  { %813 = vmatprep.subr.bf16.mxu0 %v1552_v8  ;;  %1000 = vmatpush1.bf16.msra.mxu1 %v1632_v26  ;;  %v1664_v8 = vld [vmem:[#allocation13 + $0x34] ss:$8 sps:$4 sm:$0xff]   ;;  %v1691_v26 = vld [vmem:[#allocation13 + $0xc4] ss:$8 sps:$4 sm:$0xff]  }
  0xc5   :  { %1001 = vmatprep.subr.bf16.mxu1 %v1637_v27  ;;  %v1689_v27 = vld [vmem:[#allocation13 + $0xc0] ss:$8 sps:$4 sm:$0xff]  }
  0xc7   :  { %814 = vmatpush1.bf16.msra.mxu0 %v1550_v11  ;;  %v1667_v11 = vld [vmem:[#allocation13 + $0x44] ss:$8 sps:$4 sm:$0xff]  }
  0xc8   :  { %815 = vmatprep.subr.bf16.mxu0 %v1558_v12  ;;  %1002 = vmatpush1.bf16.msra.mxu1 %v1635_v31  ;;  %v1665_v12 = vld [vmem:[#allocation13 + $0x40] ss:$8 sps:$4 sm:$0xff]  }
  0xc9   :  { %1003 = vmatprep.subr.bf16.mxu1 %v1640_v32  ;;  %v1695_v31 = vld [vmem:[#allocation13 + $0xe0] ss:$8 sps:$4 sm:$0xff]   ;;  %v1700_v32 = vld [vmem:[#allocation13 + $0xf4] ss:$8 sps:$4 sm:$0xff]  }
  0xcb   :  { %816 = vmatpush1.bf16.msra.mxu0 %v1556_v15  ;;  %v1673_v15 = vld [vmem:[#allocation13 + $0x64] ss:$8 sps:$4 sm:$0xff]  }
  0xcc   :  { %817 = vmatprep.subr.bf16.mxu0 %v1564_v16  ;;  %1004 = vmatpush1.bf16.msra.mxu1 %v1638_v35  ;;  %v1671_v16 = vld [vmem:[#allocation13 + $0x60] ss:$8 sps:$4 sm:$0xff]  }
  0xcd   :  { %1005 = vmatprep.subr.bf16.mxu1 %v1643_v36 }
  0xcf   :  { %818 = vmatpush1.bf16.msra.mxu0 %v1562_v19  ;;  %v1677_v19 = vld [vmem:[#allocation13 + $0x80] ss:$8 sps:$4 sm:$0xff]  }
  0xd0   :  { %819 = vmatprep.subr.bf16.mxu0 %v1570_v20  ;;  %1006 = vmatpush1.bf16.msra.mxu1 %v1641_v39  ;;  %v1682_v20 = vld [vmem:[#allocation13 + $0x94] ss:$8 sps:$4 sm:$0xff]   ;;  %v853_v39 = vstv %s1300_s3 }
  0xd1   :  { %1007 = vmatprep.subr.bf16.mxu1 %v1646_v40  ;;  %v849_v40 = vld [vmem:[#allocation8 + $0x8] sm:$0xff] }
  0xd3   :  { %820 = vmatpush1.bf16.msra.mxu0 %v1568_v24  ;;  %v1688_v24 = vld [vmem:[#allocation13 + $0xb4] ss:$8 sps:$4 sm:$0xff]  }
  0xd4   :  { %821 = vmatprep.subr.bf16.mxu0 %v1576_v25  ;;  %1008 = vmatpush1.bf16.msra.mxu1 %v1644_v43  ;;  %v1686_v25 = vld [vmem:[#allocation13 + $0xb0] ss:$8 sps:$4 sm:$0xff]  }
  0xd5   :  { %1009 = vmatprep.subr.bf16.mxu1 %v1649_v48  ;;  %v855_v48 = vmul.f32 %v853_v39, %v849_v40 }
  0xd7   :  { %822 = vmatpush1.bf16.msra.mxu0 %v1574_v29  ;;  %v1694_v29 = vld [vmem:[#allocation13 + $0xd4] ss:$8 sps:$4 sm:$0xff]  }
  0xd8   :  { %823 = vmatprep.subr.bf16.mxu0 %v1582_v30  ;;  %1010 = vmatpush1.bf16.msra.mxu1 %v1647_v53  ;;  %v1697_v30 = vld [vmem:[#allocation13 + $0xe4] ss:$8 sps:$4 sm:$0xff]  }
  0xd9   :  { %1011 = vmatprep.subr.bf16.mxu1 %v1652_v54 }
  0xdb   :  { %824 = vmatpush1.bf16.msra.mxu0 %v1580_v33  ;;  %v1698_v33 = vld [vmem:[#allocation13 + $0xf0] ss:$8 sps:$4 sm:$0xff]  }
  0xdc   :  { %825 = vmatprep.subr.bf16.mxu0 %v1588_v34  ;;  %1012 = vmatpush1.bf16.msra.mxu1 %v1650_v58 }
  0xdd   :  { %1198 = vmatprep.subr.bf16.mxu1 %v1655_v59 }
  0xdf   :  { %826 = vmatpush1.bf16.msra.mxu0 %v1586_v37  ;;  %1030 = vmatmul.mubr.bf16.vlgmr.msra.gmra.mrb[4].mxu1 %v900_v61 }
  0xe0   :  { %827 = vmatprep.subr.bf16.mxu0 %v1594_v38  ;;  %1199 = vmatpush1.bf16.msra.mxu1 %v1653_v63  ;;  %v848_v38 = vld [vmem:[#allocation8] sm:$0xff] }
  0xe1   :  { %1200 = vmatprep.subr.bf16.mxu1 %v1658_v1  ;;  %v854_v44 = vmul.f32 %v853_v39, %v848_v38 }
  0xe3   :  { %828 = vmatpush1.bf16.msra.mxu0 %v1592_v41 }
  0xe4   :  { %829 = vmatprep.subr.bf16.mxu0 %v1600_v42  ;;  %1201 = vmatpush1.bf16.msra.mxu1 %v1656_v4  ;;  %v850_v42 = vstv %s121_s12 }
  0xe5   :  { %1202 = vmatprep.subr.bf16.mxu1 %v1661_v5 }
  0xe7   :  { %830 = vmatpush1.bf16.msra.mxu0 %v1598_v49 }
  0xe8   :  { %831 = vmatprep.subr.bf16.mxu0 %v1606_v52  ;;  %1203 = vmatpush1.bf16.msra.mxu1 %v1659_v7 }
  0xe9   :  { %1204 = vmatprep.subr.bf16.mxu1 %v1664_v8 }
  0xeb   :  { %832 = vmatpush1.bf16.msra.mxu0 %v1604_v55 }
  0xec   :  { %833 = vmatprep.subr.bf16.mxu0 %v1612_v57  ;;  %1205 = vmatpush1.bf16.msra.mxu1 %v1662_v10  ;;  %v1241_v57 = vstv %s1301_s24 }
  0xed   :  { %1206 = vmatprep.subr.bf16.mxu1 %v1667_v11 }
  0xef   :  { %834 = vmatpush1.bf16.msra.mxu0 %v1610_v60 }
  0xf0   :  { %835 = vmatprep.subr.bf16.mxu0 %v1618_v62  ;;  %1207 = vmatpush1.bf16.msra.mxu1 %v1665_v12 }
  0xf1   :  { %1208 = vmatprep.subr.bf16.mxu1 %v1670_v13 }
  0xf3   :  { %836 = vmatpush1.bf16.msra.mxu0 %v1616_v2 }
  0xf4   :  { %837 = vmatprep.subr.bf16.mxu0 %v1626_v3  ;;  %1209 = vmatpush1.bf16.msra.mxu1 %v1668_v14 }
  0xf5   :  { %1210 = vmatprep.subr.bf16.mxu1 %v1673_v15 }
  0xf7   :  { %838 = vmatpush1.bf16.msra.mxu0 %v1624_v6 }
  0xf8   :  { %1211 = vmatpush1.bf16.msra.mxu1 %v1671_v16 }
  0xf9   :  { %1212 = vmatprep.subr.bf16.mxu1 %v1676_v17 }
  0xfa   :  { %840 = vmatmul.mubr.bf16.vlgmr.msra.gmra.mrb[0].mxu0 %v1307_v9 }
  0xfc   :  { %1213 = vmatpush1.bf16.msra.mxu1 %v1674_v0 }
  0xfd   :  { %1214 = vmatprep.subr.bf16.mxu1 %v1679_v18 }
 0x100   :  { %1215 = vmatpush1.bf16.msra.mxu1 %v1677_v19 }
 0x101   :  { %1216 = vmatprep.subr.bf16.mxu1 %v1682_v20 }
 0x104   :  { %1217 = vmatpush1.bf16.msra.mxu1 %v1680_v21 }
 0x105   :  { %1218 = vmatprep.subr.bf16.mxu1 %v1685_v22 }
 0x108   :  { %1219 = vmatpush1.bf16.msra.mxu1 %v1683_v23 }
 0x109   :  { %1220 = vmatprep.subr.bf16.mxu1 %v1688_v24 }
 0x10c   :  { %1221 = vmatpush1.bf16.msra.mxu1 %v1686_v25 }
 0x10d   :  { %1222 = vmatprep.subr.bf16.mxu1 %v1691_v26 }
 0x110   :  { %1223 = vmatpush1.bf16.msra.mxu1 %v1689_v27 }
 0x111   :  { %1224 = vmatprep.subr.bf16.mxu1 %v1694_v29 }
 0x114   :  { %1225 = vmatpush1.bf16.msra.mxu1 %v1692_v28 }
 0x115   :  { %1226 = vmatprep.subr.bf16.mxu1 %v1697_v30 }
 0x118   :  { %1227 = vmatpush1.bf16.msra.mxu1 %v1695_v31 }
 0x119   :  { %1228 = vmatprep.subr.bf16.mxu1 %v1700_v32 }
 0x11c   :  { %1229 = vmatpush1.bf16.msra.mxu1 %v1698_v33 }
 0x192   :  { %v759_v34 = vpop.f32.mrb[0].mxu1 }
 0x193   :  { %v761_v35 = vpop.f32.mrb[1].mxu1 }
 0x194   :  { %v763_v36 = vpop.f32.mrb[2].mxu1 }
 0x195   :  { %v764_v37 = vpop.f32.mrb[3].mxu1 }
 0x1cd   :  { %v841_v41 = vpop.f32.mrb[0].mxu0 }
 0x1ce   :  { %v1455_v43 = vadd.f32 %v841_v41, %v759_v34  ;;  %v843_v45 = vpop.f32.mrb[1].mxu0 }
 0x1cf   :  { %v1456_v46 = vadd.f32 %v843_v45, %v761_v35  ;;  %v845_v47 = vpop.f32.mrb[2].mxu0 }
 0x1d0   :  { %v851_v49 = vmul.f32 %v1455_v43, %v850_v42  ;;  %v846_v50 = vpop.f32.mrb[3].mxu0 }
 0x1d1   :  { %v852_v51 = vmul.f32 %v1456_v46, %v850_v42 }
 0x1d2   :  { %v856_v52 = vadd.f32 %v854_v44, %v851_v49 }
 0x1d3   :  { %v857_v53 = vadd.f32 %v855_v48, %v852_v51 }
 0x1d4   :  { %v858_v55 = vpack.c.bf16 %v856_v52, %v856_v52 }
 0x1d5   :  { %v859_v54 = vpack.c.bf16 %v857_v53, %v857_v53 }
 0x1d7   :  { %1230 = vmatprep.mubr.bf16.mxu1 %v859_v54 }
 0x1d8   :  { %1231 = vmatmul.mubr.bf16.vlgmr.msra.gmra.mrb[4].mxu1 %v858_v55 }
 0x2ab   :  { %v1232_v56 = vpop.f32.mrb[4].mxu1 }
 0x2ac   :  { %v1239_v58 = vsub.f32 %v1232_v56, %v848_v38  ;;  %v1234_v59 = vpop.f32.mrb[5].mxu1 }
 0x2ad   :  { %v1240_v60 = vsub.f32 %v1234_v59, %v849_v40  ;;  %v1236_v61 = vpop.f32.mrb[6].mxu1 }
 0x2ae   :  { %v1242_v62 = vmul.f32 %v1241_v57, %v1239_v58  ;;  %v1237_v63 = vpop.f32.mrb[7].mxu1 }
 0x2af   :  { %v1243_v1 = vmul.f32 %v1241_v57, %v1240_v60 }
 0x2b0   :  { %vm1244_vm0 = vcmp.ne.f32.partialorder %v1242_v62, %v1242_v62 }
 0x2b1   :  { %vm1245_vm1 = vcmp.ne.f32.partialorder %v1243_v1, %v1243_v1  ;;  %v1246_v2 = vsel %vm1244_vm0, 0.0, %v1242_v62 }
 0x2b2   :  { %v1247_v3 = vsel %vm1245_vm1, 0.0, %v1243_v1  ;;  %v1453_v4 = vclamps-f32 %v1246_v2, 3.4028235e+38 }
 0x2b3   :  { %v1454_v5 = vclamps-f32 %v1247_v3, 3.4028235e+38 }
 0x2b4   :  { %v1254_v6 = vmul.f32 %v1455_v43, %v1453_v4  ;;  %1252 = vst [vmem:[#allocation16] sm:$0xff] %v1453_v4 }
 0x2b5   :  { %v1255_v7 = vmul.f32 %v1456_v46, %v1454_v5  ;;  %1253 = vst [vmem:[#allocation16 + $0x8] sm:$0xff] %v1454_v5 }
 0x2b7   :  { %v1256_v8 = vadd.f32 %v1255_v7, %v1254_v6 }
 0x2b9   :  { %1257 = vadd.xlane.f32.xlu0 %v1256_v8 }
 0x2ba   :  { %1854 = shalt.err (!%p1851_p13)
}
 0x2bb   :  { %s1855_s11 = scalar_lea.hbm %s2102_s8, 256 }
 0x2bc   :  { %p1856_p0 = scmp.ne.s32.totalorder %s2102_s8, %s1855_s11  ;;  %p1859_p1 = scmp.lt.u32.totalorder %s1855_s11, %s2102_s8 }
 0x2be   :  { %p1861_p2 = pnand %p1859_p1, %p1856_p0 }
 0x2c0   :  { %1864 = shalt.err (!%p1861_p2)
}
 0x2c1   :  { %1277 = dma.vmem_to_hbm [thread:$0]  %s1275_s27, 256, %s2102_s8, [#allocation4]  }
 0x2c2   :  { %s1865_s19 = scalar_lea.hbm %s2103_s9, 16 }
 0x2c3   :  { %p1866_p3 = scmp.ne.s32.totalorder %s2103_s9, %s1865_s19  ;;  %p1869_p4 = scmp.lt.u32.totalorder %s1865_s19, %s2103_s9 }
 0x2c5   :  { %p1871_p5 = pnand %p1869_p4, %p1866_p3 }
 0x346   :  { %v1258_v9 = vpop.xlane.xlu0 %1257 }
 0x347   :  { %v1259_v10 = vrot.slane %v1258_v9, 4 }
 0x349   :  { %v1260_v11 = vadd.f32 %v1259_v10, %v1258_v9 }
 0x34b   :  { %v1261_v12 = vrot.slane %v1260_v11, 2 }
 0x34d   :  { %v1262_v13 = vadd.f32 %v1261_v12, %v1260_v11 }
 0x34f   :  { %v1263_v14 = vrot.slane %v1262_v13, 1 }
 0x351   :  { %v1264_v15 = vadd.f32 %v1263_v14, %v1262_v13 }
 0x353   :  { %1465 = vpush %v1264_v15 }
 0x384   :  { %s1466_s16 = spop %1465 }
 0x385   :  { %1267 = sst [smem:[#allocation17]] %s1466_s16 }
 0x386   :  { %1874 = shalt.err (!%p1871_p5)
}
 0x387   :  { %s1900_s23 = smov [#allocation17]  }
 0x388   :  { %1285 = dma.smem_to_hbm %s1900_s23, 16, %s2103_s9, [#allocation6]  }
 0x389   :  { %1885 = dma.done.wait [#allocation4], 256  }
 0x38a   :  { %1886 = vsyncadd [#allocation4], 4294967040 }
 0x38b   :  { %1887 = dma.done.wait [#allocation6], 16  }
 0x38c   :  { %1888 = vsyncadd [#allocation6], 4294967280 }
 0x38d   :  { %1292 = sfence }
 0x38e   :  { %1293 = vsyncpa [#allocation3], 1 }
 0x38f   :  { %1294 = vsyncpa [#allocation9], 1 }
 0x390   :  { %1295 = vsyncpa [#allocation12], 1 }
 0x391   :  { %1296 = vsyncpa [#allocation15], 1 }
 0x392   :  { %1297 = vsyncpa [#allocation4], 1 }
 0x393   :  { %1298 = vsyncpa [#allocation5], 1 }
 0x394   :  { %1299 = vsyncpa [#allocation6], 1 }

</bundles_post_ra>
